<compile_context>
chip_gen: v7x
topology: tpu7x:2x2x1
jax: 0.10.0
libtpu: 0.0.40
codegen_flags: <defaults>
</compile_context>

<pallas_src>
import functools

import jax
import jax.numpy as jnp
import numpy as np
from jax import lax
from jax.experimental import pallas as pl
from jax.experimental.pallas import tpu as pltpu

NX = 8          # the global `nx` from the original script
_SUBLANE = 8    # f32 sublane tile
_LANE = 128     # lane tile


def _gru_fused_kernel(x_ref, h0_ref, wih_ref, whh_ref, bias_ref, bhn_ref,
                      out_ref, gi_scr):
    """Whole GRU recurrence in one grid point (everything VMEM-resident).

    x_ref:    (T*Bp, F)    time-major flattened inputs (batch padded to Bp)
    h0_ref:   (Bp, Hp)     initial hidden state (hidden padded to Hp = 128k)
    wih_ref:  (F, 3*Hp)    W_ih^T, each gate in its own 128-lane stripe
    whh_ref:  (Hp, 3*Hp)   W_hh^T, same gate padding
    bias_ref: (1, 3*Hp)    [b_ih_r+b_hh_r, b_ih_z+b_hh_z, b_ih_n] padded
    bhn_ref:  (1, Hp)      b_hh_n  (must stay inside r * (...))
    out_ref:  (T, Bp, Hp)  per-step hidden states, time-major
    gi_scr:   (T*Bp, 3*Hp) VMEM scratch for the hoisted input projection
    """
    T, Bp, Hp = out_ref.shape

    # Batched input projection for ALL time steps in one MXU call
    # (independent of h -> off the serial critical path), staged to VMEM so
    # the serial loop reads sublane/lane-aligned slices.
    gi_scr[...] = jnp.dot(x_ref[...], wih_ref[...],
                          preferred_element_type=jnp.float32) + bias_ref[...]

    # Hoist weight/bias loads & broadcasts out of the loop.
    whh = whh_ref[...]                                    # (Hp, 3Hp)
    b_hn = jnp.broadcast_to(bhn_ref[...], (Bp, Hp))       # (Bp, Hp)
    h0 = h0_ref[...].astype(jnp.float32)

    # TODO(synk): explicit MXU RHS staging (pltpu.matmul_push_rhs/acc/pop) to
    # keep W_hh resident across steps was considered but skipped: per-gate
    # tiles exceed a single v5e MXU weight array, so jnp.dot is kept for
    # portability across v5e/v6e/v7x.
    def step(t, h):
        row = pl.multiple_of(t * Bp, Bp)                  # sublane-aligned start
        gi = gi_scr[pl.ds(row, Bp), :]                    # (Bp, 3Hp)
        gh = jnp.dot(h, whh, preferred_element_type=jnp.float32)  # (Bp, 3Hp)
        # One fused sigmoid stream over the r|z stripes (single EUP pass);
        # slices below are all 128-lane aligned.
        rz = jax.nn.sigmoid(gi[:, :2 * Hp] + gh[:, :2 * Hp])
        r = rz[:, :Hp]
        z = rz[:, Hp:]
        n = jnp.tanh(gi[:, 2 * Hp:] + r * (gh[:, 2 * Hp:] + b_hn))
        h_new = n + z * (h - n)                           # == (1-z)*n + z*h
        out_ref[t] = h_new.astype(out_ref.dtype)          # tile-clean per-step store
        return h_new

    lax.fori_loop(0, T, step, h0, unroll=True)


def gru_sequence_pallas(x_tbf, h0_pad, wih_pad, whh_pad, bias_pad, bhn_pad):
    """Run the GRU over a (T, Bp, F) time-major sequence. Returns (T, Bp, Hp)."""
    T, Bp, F = x_tbf.shape
    Hp = h0_pad.shape[-1]
    vmem = pltpu.MemorySpace.VMEM
    return pl.pallas_call(
        _gru_fused_kernel,
        out_shape=jax.ShapeDtypeStruct((T, Bp, Hp), jnp.float32),
        # No grid: the whole problem (a few hundred KiB) is VMEM-resident; the
        # time recurrence is an in-kernel loop, avoiding per-grid-step overhead.
        in_specs=[
            pl.BlockSpec(memory_space=vmem),  # x (T*Bp, F)
            pl.BlockSpec(memory_space=vmem),  # h0 (Bp, Hp)
            pl.BlockSpec(memory_space=vmem),  # W_ih^T (F, 3Hp)
            pl.BlockSpec(memory_space=vmem),  # W_hh^T (Hp, 3Hp)
            pl.BlockSpec(memory_space=vmem),  # folded bias (1, 3Hp)
            pl.BlockSpec(memory_space=vmem),  # b_hh_n (1, Hp)
        ],
        out_specs=pl.BlockSpec(memory_space=vmem),
        scratch_shapes=[pltpu.VMEM((T * Bp, 3 * Hp), jnp.float32)],
    )(x_tbf.reshape(T * Bp, F), h0_pad, wih_pad, whh_pad, bias_pad, bhn_pad)


@functools.partial(jax.jit, static_argnums=(0, 1))
def _plasma_gru_forward(nprofiles, nx, wih_pad, whh_pad, bias_pad, bhn_pad,
                        profiles_tensor, actuators_tensor, parameters_tensor):
    # Entire forward is one jit: the slice/transpose/pad ops around the kernel
    # fuse into the surrounding computation (no standalone dispatch per op).
    lookahead = actuators_tensor.shape[1] - parameters_tensor.shape[1]
    B = actuators_tensor.shape[0]
    H = nprofiles * nx
    Hp = whh_pad.shape[0]
    Bp = ((B + _SUBLANE - 1) // _SUBLANE) * _SUBLANE

    # h0 = flatten(profiles[:, -lookahead-1]) padded to (Bp, Hp); padded
    # lanes/rows stay zero through the recurrence.
    h0 = profiles_tensor[:, -lookahead - 1, :, :].reshape(B, H)
    h0_pad = jnp.zeros((Bp, Hp), jnp.float32).at[:B, :H].set(h0)

    # actuators[:, -lookahead:] -> time-major, batch padded to a sublane tile.
    x = jnp.transpose(actuators_tensor[:, -lookahead:, :], (1, 0, 2))   # (L,B,F)
    x = jnp.pad(x, ((0, 0), (0, Bp - B), (0, 0)))                       # (L,Bp,F)

    hid = gru_sequence_pallas(x, h0_pad, wih_pad, whh_pad, bias_pad, bhn_pad)
    hid = jnp.transpose(hid[:, :B, :H], (1, 0, 2))                      # (B,L,H)
    return hid.reshape(B, lookahead, nprofiles, nx)


class PlasmaGRUPallas:
    """JAX/Pallas equivalent of the PyTorch PlasmaGRU module."""

    def __init__(self, nprofiles, nactuators, key):
        self.nprofiles = nprofiles
        self.nx = NX
        H = nprofiles * NX
        self.hidden_size = H
        Hp = ((H + _LANE - 1) // _LANE) * _LANE   # 128-lane stripe per gate
        self.Hp = Hp

        k = 1.0 / np.sqrt(H)
        k1, k2, k3, k4 = jax.random.split(key, 4)
        # PyTorch GRU params: weight_ih_l0 (3H, F), weight_hh_l0 (3H, H),
        # bias_ih_l0 (3H,), bias_hh_l0 (3H,), gate order [r, z, n], U(-k, k).
        self.w_ih = jax.random.uniform(k1, (3 * H, nactuators), jnp.float32, -k, k)
        self.w_hh = jax.random.uniform(k2, (3 * H, H), jnp.float32, -k, k)
        self.b_ih = jax.random.uniform(k3, (3 * H,), jnp.float32, -k, k)
        self.b_hh = jax.random.uniform(k4, (3 * H,), jnp.float32, -k, k)

        # ---- Kernel layouts, built once host-side (nothing per-call) -------
        # Each gate's H columns are placed at lane offset g*Hp (128-aligned),
        # so in-kernel gate slices never rotate/select across lanes.  Padded
        # lanes carry zero weights & biases.  b_hh_{r,z} is folded into the
        # input-projection bias; b_hh_n stays separate (inside r * (...)).
        w_ih = np.asarray(self.w_ih)
        w_hh = np.asarray(self.w_hh)
        b_ih = np.asarray(self.b_ih)
        b_hh = np.asarray(self.b_hh)
        b_fold = b_ih.copy()
        b_fold[: 2 * H] += b_hh[: 2 * H]

        wih_pad = np.zeros((nactuators, 3 * Hp), np.float32)
        whh_pad = np.zeros((Hp, 3 * Hp), np.float32)
        bias_pad = np.zeros((1, 3 * Hp), np.float32)
        bhn_pad = np.zeros((1, Hp), np.float32)
        for g in range(3):
            wih_pad[:, g * Hp:g * Hp + H] = w_ih[g * H:(g + 1) * H, :].T
            whh_pad[:H, g * Hp:g * Hp + H] = w_hh[g * H:(g + 1) * H, :].T
            bias_pad[0, g * Hp:g * Hp + H] = b_fold[g * H:(g + 1) * H]
        bhn_pad[0, :H] = b_hh[2 * H:]

        self.wih_pad = jnp.asarray(wih_pad)
        self.whh_pad = jnp.asarray(whh_pad)
        self.bias_pad = jnp.asarray(bias_pad)
        self.bhn_pad = jnp.asarray(bhn_pad)

    def __call__(self, profiles_tensor, actuators_tensor, parameters_tensor):
        # profiles_tensor:   (B, T_prof, nprofiles, nx)
        # actuators_tensor:  (B, T_act, nactuators)
        # parameters_tensor: (B, T_param, nparams)  (only its time dim is used)
        return _plasma_gru_forward(
            self.nprofiles, self.nx,
            self.wih_pad, self.whh_pad, self.bias_pad, self.bhn_pad,
            profiles_tensor, actuators_tensor, parameters_tensor)


def _gru_reference(x_btf, h0, w_ih, w_hh, b_ih, b_hh):
    """Pure-JAX reference GRU (PyTorch gate convention) for verification."""
    H = h0.shape[-1]

    def step(h, x):
        gi = x @ w_ih.T + b_ih
        gh = h @ w_hh.T + b_hh
        i_r, i_z, i_n = gi[:, :H], gi[:, H:2 * H], gi[:, 2 * H:]
        h_r, h_z, h_n = gh[:, :H], gh[:, H:2 * H], gh[:, 2 * H:]
        r = jax.nn.sigmoid(i_r + h_r)
        z = jax.nn.sigmoid(i_z + h_z)
        n = jnp.tanh(i_n + r * h_n)
        h_new = (1.0 - z) * n + z * h
        return h_new, h_new

    _, outs = lax.scan(step, h0, jnp.transpose(x_btf, (1, 0, 2)))
    return jnp.transpose(outs, (1, 0, 2))


if __name__ == "__main__":
    key = jax.random.PRNGKey(0)
    k_model, k_prof, k_act, k_par = jax.random.split(key, 4)

    nprofiles = 4        # len(profiles)
    nactuators = 5       # len(actuators)
    nparams = 3          # len(parameters)  (only time-dim matters)
    B = 2
    T_act = 8
    T_param = 5          # => lookahead = 3
    T_prof = 8

    model = PlasmaGRUPallas(nprofiles, nactuators, k_model)

    profiles_tensor = jax.random.normal(k_prof, (B, T_prof, nprofiles, NX), jnp.float32)
    actuators_tensor = jax.random.normal(k_act, (B, T_act, nactuators), jnp.float32)
    parameters_tensor = jax.random.normal(k_par, (B, T_param, nparams), jnp.float32)

    out = model(profiles_tensor, actuators_tensor, parameters_tensor)
    out = jax.block_until_ready(out)

    # Verify against a pure-JAX reference implementation.
    lookahead = T_act - T_param
    h0 = profiles_tensor[:, -lookahead - 1, :, :].reshape(B, nprofiles * NX)
    ref = _gru_reference(actuators_tensor[:, -lookahead:, :], h0,
                         model.w_ih, model.w_hh, model.b_ih, model.b_hh)
    ref = ref.reshape(B, lookahead, nprofiles, NX)
    assert out.shape == (B, lookahead, nprofiles, NX)
    assert np.allclose(np.asarray(out), np.asarray(ref), atol=1e-4, rtol=1e-4)

    print("KERNEL_OK")
</pallas_src>

<mosaic_0001>
module attributes {stable_mosaic.version = 11 : i64} {
  func.func @_gru_fused_kernel(%arg0: memref<24x5xf32, #tpu.memory_space<vmem>>, %arg1: memref<8x128xf32, #tpu.memory_space<vmem>>, %arg2: memref<5x384xf32, #tpu.memory_space<vmem>>, %arg3: memref<128x384xf32, #tpu.memory_space<vmem>>, %arg4: memref<1x384xf32, #tpu.memory_space<vmem>>, %arg5: memref<1x128xf32, #tpu.memory_space<vmem>>, %arg6: memref<3x8x128xf32, #tpu.memory_space<vmem>>, %arg7: memref<24x384xf32, #tpu.memory_space<vmem>>) attributes {dimension_semantics = [], scalar_prefetch = 0 : i64, scratch_operands = 1 : i64, tpu.core_type = #tpu.core_type<tc>} {
    %c0 = arith.constant 0 : index
    %c0_0 = arith.constant 0 : index
    %0 = vector.load %arg0[%c0, %c0_0] : memref<24x5xf32, #tpu.memory_space<vmem>>, vector<24x5xf32>
    %c0_1 = arith.constant 0 : index
    %c0_2 = arith.constant 0 : index
    %1 = vector.load %arg2[%c0_1, %c0_2] : memref<5x384xf32, #tpu.memory_space<vmem>>, vector<5x384xf32>
    %cst = arith.constant dense<0.000000e+00> : vector<24x384xf32>
    %2 = tpu.matmul %0, %1, %cst {dimension_numbers = #tpu.dot_dimension_numbers<[1], [0], [0], [1], [0, 0, 1, 1], [], []>} : vector<24x5xf32>, vector<5x384xf32>, vector<24x384xf32> -> vector<24x384xf32>
    %c0_3 = arith.constant 0 : index
    %c0_4 = arith.constant 0 : index
    %3 = vector.load %arg4[%c0_3, %c0_4] : memref<1x384xf32, #tpu.memory_space<vmem>>, vector<1x384xf32>
    %4 = vector.broadcast %3 : vector<1x384xf32> to vector<24x384xf32>
    %5 = arith.addf %2, %4 : vector<24x384xf32>
    %c0_5 = arith.constant 0 : index
    %c0_6 = arith.constant 0 : index
    %6 = vector.load %arg7[%c0_5, %c0_6] : memref<24x384xf32, #tpu.memory_space<vmem>>, vector<24x384xf32>
    tpu.vector_store %arg7[%c0_5, %c0_6], %5 {strides = array<i32>} : memref<24x384xf32, #tpu.memory_space<vmem>>, vector<24x384xf32>,
    %c0_7 = arith.constant 0 : index
    %c0_8 = arith.constant 0 : index
    %7 = vector.load %arg3[%c0_7, %c0_8] : memref<128x384xf32, #tpu.memory_space<vmem>>, vector<128x384xf32>
    %c0_9 = arith.constant 0 : index
    %c0_10 = arith.constant 0 : index
    %8 = vector.load %arg5[%c0_9, %c0_10] : memref<1x128xf32, #tpu.memory_space<vmem>>, vector<1x128xf32>
    %9 = vector.shape_cast %8 : vector<1x128xf32> to vector<1x128xf32>
    %10 = vector.broadcast %9 : vector<1x128xf32> to vector<8x128xf32>
    %c0_11 = arith.constant 0 : index
    %c0_12 = arith.constant 0 : index
    %11 = vector.load %arg1[%c0_11, %c0_12] : memref<8x128xf32, #tpu.memory_space<vmem>>, vector<8x128xf32>
    %c0_i32 = arith.constant 0 : i32
    %c8_i32 = arith.constant 8 : i32
    %12 = arith.muli %c0_i32, %c8_i32 : i32
    %13 = tpu.assume_multiple %12, 8 : i32
    %14 = arith.index_cast %13 : i32 to index
    %c0_13 = arith.constant 0 : index
    %15 = vector.load %arg7[%14, %c0_13] : memref<24x384xf32, #tpu.memory_space<vmem>>, vector<8x384xf32>
    %cst_14 = arith.constant dense<0.000000e+00> : vector<8x384xf32>
    %16 = tpu.matmul %11, %7, %cst_14 {dimension_numbers = #tpu.dot_dimension_numbers<[1], [0], [0], [1], [0, 0, 1, 1], [], []>} : vector<8x128xf32>, vector<128x384xf32>, vector<8x384xf32> -> vector<8x384xf32>
    %17 = vector.extract_strided_slice %15 {offsets = [0, 0], sizes = [8, 256], strides = [1, 1]} : vector<8x384xf32> to vector<8x256xf32>
    %18 = vector.extract_strided_slice %16 {offsets = [0, 0], sizes = [8, 256], strides = [1, 1]} : vector<8x384xf32> to vector<8x256xf32>
    %19 = arith.addf %17, %18 : vector<8x256xf32>
    %20 = arith.negf %19 : vector<8x256xf32>
    %21 = math.exp %20 : vector<8x256xf32>
    %cst_15 = arith.constant 1.000000e+00 : f32
    %22 = vector.broadcast %cst_15 : f32 to vector<8x256xf32>
    %23 = arith.addf %22, %21 : vector<8x256xf32>
    %24 = arith.divf %22, %23 : vector<8x256xf32>
    %25 = vector.extract_strided_slice %24 {offsets = [0, 0], sizes = [8, 128], strides = [1, 1]} : vector<8x256xf32> to vector<8x128xf32>
    %26 = vector.extract_strided_slice %24 {offsets = [0, 128], sizes = [8, 128], strides = [1, 1]} : vector<8x256xf32> to vector<8x128xf32>
    %27 = vector.extract_strided_slice %15 {offsets = [0, 256], sizes = [8, 128], strides = [1, 1]} : vector<8x384xf32> to vector<8x128xf32>
    %28 = vector.extract_strided_slice %16 {offsets = [0, 256], sizes = [8, 128], strides = [1, 1]} : vector<8x384xf32> to vector<8x128xf32>
    %29 = arith.addf %28, %10 : vector<8x128xf32>
    %30 = arith.mulf %25, %29 : vector<8x128xf32>
    %31 = arith.addf %27, %30 : vector<8x128xf32>
    %32 = math.tanh %31 : vector<8x128xf32>
    %33 = arith.subf %11, %32 : vector<8x128xf32>
    %34 = arith.mulf %26, %33 : vector<8x128xf32>
    %35 = arith.addf %32, %34 : vector<8x128xf32>
    %36 = arith.index_cast %c0_i32 : i32 to index
    %c0_16 = arith.constant 0 : index
    %c0_17 = arith.constant 0 : index
    %37 = vector.load %arg6[%36, %c0_16, %c0_17] : memref<3x8x128xf32, #tpu.memory_space<vmem>>, vector<1x8x128xf32>
    %38 = vector.shape_cast %37 : vector<1x8x128xf32> to vector<8x128xf32>
    %39 = vector.shape_cast %35 : vector<8x128xf32> to vector<1x8x128xf32>
    tpu.vector_store %arg6[%36, %c0_16, %c0_17], %39 {strides = array<i32>} : memref<3x8x128xf32, #tpu.memory_space<vmem>>, vector<1x8x128xf32>,
    %c1_i32 = arith.constant 1 : i32
    %c8_i32_18 = arith.constant 8 : i32
    %40 = arith.muli %c1_i32, %c8_i32_18 : i32
    %41 = tpu.assume_multiple %40, 8 : i32
    %42 = arith.index_cast %41 : i32 to index
    %c0_19 = arith.constant 0 : index
    %43 = vector.load %arg7[%42, %c0_19] : memref<24x384xf32, #tpu.memory_space<vmem>>, vector<8x384xf32>
    %cst_20 = arith.constant dense<0.000000e+00> : vector<8x384xf32>
    %44 = tpu.matmul %35, %7, %cst_20 {dimension_numbers = #tpu.dot_dimension_numbers<[1], [0], [0], [1], [0, 0, 1, 1], [], []>} : vector<8x128xf32>, vector<128x384xf32>, vector<8x384xf32> -> vector<8x384xf32>
    %45 = vector.extract_strided_slice %43 {offsets = [0, 0], sizes = [8, 256], strides = [1, 1]} : vector<8x384xf32> to vector<8x256xf32>
    %46 = vector.extract_strided_slice %44 {offsets = [0, 0], sizes = [8, 256], strides = [1, 1]} : vector<8x384xf32> to vector<8x256xf32>
    %47 = arith.addf %45, %46 : vector<8x256xf32>
    %48 = arith.negf %47 : vector<8x256xf32>
    %49 = math.exp %48 : vector<8x256xf32>
    %cst_21 = arith.constant 1.000000e+00 : f32
    %50 = vector.broadcast %cst_21 : f32 to vector<8x256xf32>
    %51 = arith.addf %50, %49 : vector<8x256xf32>
    %52 = arith.divf %50, %51 : vector<8x256xf32>
    %53 = vector.extract_strided_slice %52 {offsets = [0, 0], sizes = [8, 128], strides = [1, 1]} : vector<8x256xf32> to vector<8x128xf32>
    %54 = vector.extract_strided_slice %52 {offsets = [0, 128], sizes = [8, 128], strides = [1, 1]} : vector<8x256xf32> to vector<8x128xf32>
    %55 = vector.extract_strided_slice %43 {offsets = [0, 256], sizes = [8, 128], strides = [1, 1]} : vector<8x384xf32> to vector<8x128xf32>
    %56 = vector.extract_strided_slice %44 {offsets = [0, 256], sizes = [8, 128], strides = [1, 1]} : vector<8x384xf32> to vector<8x128xf32>
    %57 = arith.addf %56, %10 : vector<8x128xf32>
    %58 = arith.mulf %53, %57 : vector<8x128xf32>
    %59 = arith.addf %55, %58 : vector<8x128xf32>
    %60 = math.tanh %59 : vector<8x128xf32>
    %61 = arith.subf %35, %60 : vector<8x128xf32>
    %62 = arith.mulf %54, %61 : vector<8x128xf32>
    %63 = arith.addf %60, %62 : vector<8x128xf32>
    %64 = arith.index_cast %c1_i32 : i32 to index
    %c0_22 = arith.constant 0 : index
    %c0_23 = arith.constant 0 : index
    %65 = vector.load %arg6[%64, %c0_22, %c0_23] : memref<3x8x128xf32, #tpu.memory_space<vmem>>, vector<1x8x128xf32>
    %66 = vector.shape_cast %65 : vector<1x8x128xf32> to vector<8x128xf32>
    %67 = vector.shape_cast %63 : vector<8x128xf32> to vector<1x8x128xf32>
    tpu.vector_store %arg6[%64, %c0_22, %c0_23], %67 {strides = array<i32>} : memref<3x8x128xf32, #tpu.memory_space<vmem>>, vector<1x8x128xf32>,
    %c2_i32 = arith.constant 2 : i32
    %c8_i32_24 = arith.constant 8 : i32
    %68 = arith.muli %c2_i32, %c8_i32_24 : i32
    %69 = tpu.assume_multiple %68, 8 : i32
    %70 = arith.index_cast %69 : i32 to index
    %c0_25 = arith.constant 0 : index
    %71 = vector.load %arg7[%70, %c0_25] : memref<24x384xf32, #tpu.memory_space<vmem>>, vector<8x384xf32>
    %cst_26 = arith.constant dense<0.000000e+00> : vector<8x384xf32>
    %72 = tpu.matmul %63, %7, %cst_26 {dimension_numbers = #tpu.dot_dimension_numbers<[1], [0], [0], [1], [0, 0, 1, 1], [], []>} : vector<8x128xf32>, vector<128x384xf32>, vector<8x384xf32> -> vector<8x384xf32>
    %73 = vector.extract_strided_slice %71 {offsets = [0, 0], sizes = [8, 256], strides = [1, 1]} : vector<8x384xf32> to vector<8x256xf32>
    %74 = vector.extract_strided_slice %72 {offsets = [0, 0], sizes = [8, 256], strides = [1, 1]} : vector<8x384xf32> to vector<8x256xf32>
    %75 = arith.addf %73, %74 : vector<8x256xf32>
    %76 = arith.negf %75 : vector<8x256xf32>
    %77 = math.exp %76 : vector<8x256xf32>
    %cst_27 = arith.constant 1.000000e+00 : f32
    %78 = vector.broadcast %cst_27 : f32 to vector<8x256xf32>
    %79 = arith.addf %78, %77 : vector<8x256xf32>
    %80 = arith.divf %78, %79 : vector<8x256xf32>
    %81 = vector.extract_strided_slice %80 {offsets = [0, 0], sizes = [8, 128], strides = [1, 1]} : vector<8x256xf32> to vector<8x128xf32>
    %82 = vector.extract_strided_slice %80 {offsets = [0, 128], sizes = [8, 128], strides = [1, 1]} : vector<8x256xf32> to vector<8x128xf32>
    %83 = vector.extract_strided_slice %71 {offsets = [0, 256], sizes = [8, 128], strides = [1, 1]} : vector<8x384xf32> to vector<8x128xf32>
    %84 = vector.extract_strided_slice %72 {offsets = [0, 256], sizes = [8, 128], strides = [1, 1]} : vector<8x384xf32> to vector<8x128xf32>
    %85 = arith.addf %84, %10 : vector<8x128xf32>
    %86 = arith.mulf %81, %85 : vector<8x128xf32>
    %87 = arith.addf %83, %86 : vector<8x128xf32>
    %88 = math.tanh %87 : vector<8x128xf32>
    %89 = arith.subf %63, %88 : vector<8x128xf32>
    %90 = arith.mulf %82, %89 : vector<8x128xf32>
    %91 = arith.addf %88, %90 : vector<8x128xf32>
    %92 = arith.index_cast %c2_i32 : i32 to index
    %c0_28 = arith.constant 0 : index
    %c0_29 = arith.constant 0 : index
    %93 = vector.load %arg6[%92, %c0_28, %c0_29] : memref<3x8x128xf32, #tpu.memory_space<vmem>>, vector<1x8x128xf32>
    %94 = vector.shape_cast %93 : vector<1x8x128xf32> to vector<8x128xf32>
    %95 = vector.shape_cast %91 : vector<8x128xf32> to vector<1x8x128xf32>
    tpu.vector_store %arg6[%92, %c0_28, %c0_29], %95 {strides = array<i32>} : memref<3x8x128xf32, #tpu.memory_space<vmem>>, vector<1x8x128xf32>,
    %c3_i32 = arith.constant 3 : i32
    return
  }
}

</mosaic_0001>

<bundles_post_ra>
// kernel: _plasma_gru_forward.1
= control target key start
LH: loop header
LB: loop body
LE: loop exit
PB: predicated region body
PF: predicated region fallthrough
CT: control target
= control target key end

     0   :  { %11 = vsyncpa [#allocation4], 0  ;;  %s1253_s21 = smov [#allocation3]   ;;  %s1540_s0 = inlined_call_operand.vmem [shape: f32[24,5], index: 0, kind: input, shape index: {}]   ;;  %s1541_s1 = inlined_call_operand.vmem [shape: f32[8,128], index: 1, kind: input, shape index: {}]   ;;  %s1542_s2 = inlined_call_operand.vmem [shape: f32[5,384], index: 2, kind: input, shape index: {}]   ;;  %s1543_s3 = inlined_call_operand.hbm [shape: f32[128,384], index: 3, kind: input, shape index: {}]   ;;  %s1544_s4 = inlined_call_operand.vmem [shape: f32[1,384], index: 4, kind: input, shape index: {}]   ;;  %s1545_s5 = inlined_call_operand.vmem [shape: f32[1,128], index: 5, kind: input, shape index: {}]   ;;  %s1546_s6 = inlined_call_operand.vmem [shape: f32[3,8,128], index: 6, kind: output, shape index: {}]  }
   0x1   :  { %s23_s22 = sshll.u32 %s1253_s21, 4  ;;  %s1229_s25 = scalar_lea.hbm %s1543_s3, 6144  ;;  %s24_s22 = int_to_ptr.vmem [resolvable:$true] %s23_s22 }
   0x2   :  { %p1230_p0 = scmp.ne.s32.totalorder %s1543_s3, %s1229_s25  ;;  %p1233_p1 = scmp.lt.u32.totalorder %s1229_s25, %s1543_s3 }
   0x4   :  { %p1235_p2 = pnand %p1233_p1, %p1230_p0 }
   0x6   :  { %1238 = shalt.err (!%p1235_p2)
}
   0x7   :  { %s1239_s30 = scalar_lea.vmem %s24_s22, 6144  ;;  %p1244_p4 = scmp.lt.s32.totalorder %s24_s22, %s24_s22 }
   0x8   :  { %p1240_p3 = scmp.ne.s32.totalorder %s24_s22, %s1239_s30  ;;  %p1245_p5 = scmp.lt.s32.totalorder %s1239_s30, %s1239_s30 }
   0xa   :  { %p1246_p6 = por %p1245_p5, %p1244_p4 }
   0xc   :  { %p1247_p7 = pnand %p1246_p6, %p1240_p3 }
   0xe   :  { %1250 = shalt.err (!%p1247_p7)
}
   0xf   :  { %s1254_s7 = smov 384   ;;  %s1255_s8 = smov 24  }
  0x10   :  { %29 = dma.hbm_to_vmem [thread:$0]  %s1543_s3, 6144, %s24_s22, [#allocation4], %s1254_s7, %s1254_s7, %s1255_s8  }
  0x11   :  { %1251 = dma.done.wait [#allocation4], 6144  }
  0x12   :  { %1252 = vsyncadd [#allocation4], 4294961152  ;;  %v1256_v0 = vmov 0.0   ;;  %vm1257_vm0 = vmmov 0   ;;  %vm70_vm1 = vcmask 1044480   ;;  %v253_v3 = vld [vmem:[#allocation3 + $0x8] sm:$0xff] }
  0x13   :  { %144 = vmatprep.mubr.f32.mxu0 %v1256_v0  ;;  %897 = vmatprep.subr.mxu1 %v1256_v0  ;;  %v41_v1 = vld [vmem:[%s1542_s2 + $0x8] sm:$0x1f]  ;;  %v40_v2 = vld [vmem:[%s1542_s2] sm:$0x1f]  ;;  %vm60_vm2 = vcmask 39936   ;;  %v255_v8 = vld [vmem:[#allocation3 + $0x18] sm:$0xff] }
  0x14   :  { %899 = vmatprep.mubr.msk.f32.mxu1 %vm1257_vm0, %v1256_v0  ;;  %824 = vmatprep.subr.msk.mxu0 %vm70_vm1, %v41_v1  ;;  %v256_v4 = vld [vmem:[#allocation3 + $0x20] sm:$0xff]  ;;  %v259_v9 = vld [vmem:[#allocation3 + $0x38] sm:$0xff]  ;;  %v262_v10 = vld [vmem:[#allocation3 + $0x50] sm:$0xff]  ;;  %v1258_v33 = vmov 0.0|0.0  }
  0x15   :  { %v37_v5 = vld [vmem:[%s1540_s0] sm:$0xff]  ;;  %825 = vmatpush1.msk.msra.mxu0 %vm70_vm1, %v40_v2  ;;  %v1321_v7 = vpack.c.bf16 %v256_v4, %v253_v3  ;;  %v1326_v12 = vpack.c.bf16 %v262_v10, %v259_v9  ;;  %v258_v13 = vld [vmem:[#allocation3 + $0x30] sm:$0xff]  ;;  %v261_v14 = vld [vmem:[#allocation3 + $0x48] sm:$0xff] }
  0x16   :  { %v252_v6 = vld [vmem:[#allocation3] sm:$0xff]  ;;  %826 = vmatmul.mubr.msk.f32.vlgmr.msra.gmra.mrb[0].mxu0 %vm60_vm2, %v37_v5  ;;  %v265_v15 = vld [vmem:[#allocation3 + $0x68] sm:$0xff]  ;;  %v1331_v17 = vpack.c.bf16 %v261_v14, %v258_v13  ;;  %v267_v20 = vld [vmem:[#allocation3 + $0x78] sm:$0xff] }
  0x17   :  { %v1324_v11 = vpack.c.bf16 %v255_v8, %v252_v6  ;;  %1014 = vmatprep.subr.bf16.mxu0 %v1321_v7  ;;  %v268_v16 = vld [vmem:[#allocation3 + $0x80] sm:$0xff]  ;;  %150 = vmatprep.mubr.f32.mxu0 %v1256_v0  ;;  %v271_v21 = vld [vmem:[#allocation3 + $0x98] sm:$0xff]  ;;  %v274_v22 = vld [vmem:[#allocation3 + $0xb0] sm:$0xff] }
  0x18   :  { %v1334_v18 = vpack.c.bf16 %v268_v16, %v265_v15  ;;  %v264_v19 = vld [vmem:[#allocation3 + $0x60] sm:$0xff]  ;;  %v38_v24 = vld [vmem:[%s1540_s0 + $0x8] sm:$0xff]  ;;  %v42_v25 = vld [vmem:[%s1542_s2 + $0x10] sm:$0x1f]  ;;  %v1346_v26 = vpack.c.bf16 %v274_v22, %v271_v21 }
  0x19   :  { %1016 = vmatpush1.bf16.msra.mxu0 %v1324_v11  ;;  %v1337_v23 = vpack.c.bf16 %v267_v20, %v264_v19  ;;  %v270_v27 = vld [vmem:[#allocation3 + $0x90] sm:$0xff]  ;;  %v273_v28 = vld [vmem:[#allocation3 + $0xa8] sm:$0xff]  ;;  %v280_v30 = vld [vmem:[#allocation3 + $0xe0] sm:$0xff]  ;;  %898 = vmatpush3.msk.msra.mxu1 %vm70_vm1, %v42_v25 }
  0x1a   :  { %1018 = vmatprep.subr.bf16.mxu0 %v1326_v12  ;;  %v277_v29 = vld [vmem:[#allocation3 + $0xc8] sm:$0xff]  ;;  %827 = vmatmul.mubr.msk.f32.gmra.mrb[2].mxu0 %vm60_vm2, %v38_v24  ;;  %v254_v31 = vld [vmem:[#allocation3 + $0x10] sm:$0xff]  ;;  %v1359_v36 = vpack.c.bf16 %v273_v28, %v270_v27  ;;  %v260_v37 = vld [vmem:[#allocation3 + $0x40] sm:$0xff] }
  0x1b   :  { %v257_v32 = vld [vmem:[#allocation3 + $0x28] sm:$0xff]  ;;  %156 = vmatprep.mubr.f32.mxu0 %v1256_v0  ;;  %1045 = vmatprep.subr.bf16.mxu1 %v1258_v33  ;;  %v39_v35 = vld [vmem:[%s1540_s0 + $0x10] sm:$0xff]  ;;  %v263_v38 = vld [vmem:[#allocation3 + $0x58] sm:$0xff]  ;;  %v1364_v39 = vpack.c.bf16 %v280_v30, %v277_v29 }
  0x1c   :  { %900 = vmatmul.mubr.msk.f32.vlgmr.msra.gmra.mrb[0].mxu1 %vm60_vm2, %v37_v5  ;;  %v1353_v34 = vpack.c.bf16 %v257_v32, %v254_v31  ;;  %v276_v40 = vld [vmem:[#allocation3 + $0xc0] sm:$0xff]  ;;  %v279_v41 = vld [vmem:[#allocation3 + $0xd8] sm:$0xff]  ;;  %v1367_v43 = vpack.c.bf16 %v263_v38, %v260_v37  ;;  %v286_v44 = vld [vmem:[#allocation3 + $0x110] sm:$0xff] }
  0x1d   :  { %1020 = vmatpush1.bf16.msra.mxu0 %v1331_v17  ;;  %902 = vmatprep.mubr.msk.f32.mxu1 %vm1257_vm0, %v1256_v0  ;;  %v283_v42 = vld [vmem:[#allocation3 + $0xf8] sm:$0xff]  ;;  %v266_v45 = vld [vmem:[#allocation3 + $0x70] sm:$0xff]  ;;  %v269_v46 = vld [vmem:[#allocation3 + $0x88] sm:$0xff]  ;;  %v1374_v47 = vpack.c.bf16 %v279_v41, %v276_v40 }
  0x1e   :  { %1022 = vmatprep.subr.bf16.mxu0 %v1334_v18  ;;  %1047 = vmatpush3.bf16.msra.mxu1 %v1353_v34  ;;  %v1379_v48 = vpack.c.bf16 %v286_v44, %v283_v42  ;;  %v282_v49 = vld [vmem:[#allocation3 + $0xf0] sm:$0xff]  ;;  %v285_v50 = vld [vmem:[#allocation3 + $0x108] sm:$0xff]  ;;  %v1382_v52 = vpack.c.bf16 %v269_v46, %v266_v45  ;;  %v292_v53 = vld [vmem:[#allocation3 + $0x140] sm:$0xff] }
  0x1f   :  { %828 = vmatmul.mubr.msk.f32.gmra.mrb[4].mxu0 %vm60_vm2, %v39_v35  ;;  %1048 = vmatprep.subr.bf16.mxu1 %v1258_v33  ;;  %v289_v51 = vld [vmem:[#allocation3 + $0x128] sm:$0xff]  ;;  %v272_v54 = vld [vmem:[#allocation3 + $0xa0] sm:$0xff]  ;;  %v275_v55 = vld [vmem:[#allocation3 + $0xb8] sm:$0xff]  ;;  %v1387_v56 = vpack.c.bf16 %v285_v50, %v282_v49 }
  0x20   :  { %378 = vmatprep.mubr.f32.mxu0 %v1256_v0  ;;  %903 = vmatmul.mubr.msk.f32.gmra.mrb[2].mxu1 %vm60_vm2, %v38_v24  ;;  %v1392_v57 = vpack.c.bf16 %v292_v53, %v289_v51  ;;  %v288_v58 = vld [vmem:[#allocation3 + $0x120] sm:$0xff]  ;;  %v291_v59 = vld [vmem:[#allocation3 + $0x138] sm:$0xff]  ;;  %v1395_v61 = vpack.c.bf16 %v275_v55, %v272_v54  ;;  %v298_v62 = vld [vmem:[#allocation3 + $0x170] sm:$0xff]  ;;  %v45_v24 = vlaneseq }
  0x21   :  { %1024 = vmatpush1.bf16.msra.mxu0 %v1337_v23  ;;  %905 = vmatprep.mubr.msk.f32.mxu1 %vm1257_vm0, %v1256_v0  ;;  %v295_v60 = vld [vmem:[#allocation3 + $0x158] sm:$0xff]  ;;  %v278_v63 = vld [vmem:[#allocation3 + $0xd0] sm:$0xff]  ;;  %v281_v1 = vld [vmem:[#allocation3 + $0xe8] sm:$0xff]  ;;  %v1399_v2 = vpack.c.bf16 %v291_v59, %v288_v58 }
  0x22   :  { %1026 = vmatprep.subr.bf16.mxu0 %v1346_v26  ;;  %1050 = vmatpush3.bf16.msra.mxu1 %v1367_v43  ;;  %v1402_v3 = vpack.c.bf16 %v298_v62, %v295_v60  ;;  %v294_v4 = vld [vmem:[#allocation3 + $0x150] sm:$0xff]  ;;  %v297_v5 = vld [vmem:[#allocation3 + $0x168] sm:$0xff]  ;;  %v1405_v6 = vpack.c.bf16 %v281_v1, %v278_v63  ;;  %v284_v8 = vld [vmem:[#allocation3 + $0x100] sm:$0xff]  ;;  %v46_v25 = vshrl.u32 %v45_v24, 7 }
  0x23   :  { %1051 = vmatprep.subr.bf16.mxu1 %v1258_v33  ;;  %v287_v9 = vld [vmem:[#allocation3 + $0x118] sm:$0xff]  ;;  %v1409_v10 = vpack.c.bf16 %v297_v5, %v294_v4  ;;  %v290_v14 = vld [vmem:[#allocation3 + $0x130] sm:$0xff]  ;;  %v293_v15 = vld [vmem:[#allocation3 + $0x148] sm:$0xff] }
  0x24   :  { %906 = vmatmul.mubr.msk.f32.gmra.mrb[4].mxu1 %vm60_vm2, %v39_v35  ;;  %v1413_v13 = vpack.c.bf16 %v287_v9, %v284_v8  ;;  %v1420_v16 = vld [vmem:[%s1541_s1] sm:$0xff]  ;;  %v1423_v19 = vpack.c.bf16 %v293_v15, %v290_v14  ;;  %v299_v21 = vld [vmem:[#allocation3 + $0x178] sm:$0xff]  ;;  %v55_v27 = vsub.s32 2, %v46_v25  ;;  %v47_v41 = vsub.s32 0, %v46_v25 }
  0x25   :  { %1028 = vmatpush1.bf16.msra.mxu0 %v1359_v36  ;;  %940 = vmatprep.mubr.msk.f32.mxu1 %vm1257_vm0, %v1256_v0  ;;  %v296_v20 = vld [vmem:[#allocation3 + $0x160] sm:$0xff]  ;;  %v51_v46 = vsub.s32 1, %v46_v25 }
  0x26   :  { %1030 = vmatprep.subr.bf16.mxu0 %v1364_v39  ;;  %1053 = vmatpush3.bf16.msra.mxu1 %v1382_v52  ;;  %v1431_v22 = vpack.c.bf16 %v299_v21, %v296_v20  ;;  %v43_v28 = vld [vmem:[%s1544_s4] sm:$0x7] }
  0x27   :  { %1054 = vmatprep.subr.bf16.mxu1 %v1258_v33  ;;  %v1477_v42 = vrot.slane %v43_v28, %v47_v41  ;;  %v1480_v51 = vrot.slane %v43_v28, %v51_v46  ;;  %v1486_v62 = vld [vmem:[%s1545_s5] ss:$0 sm:$0xff] }
  0x29   :  { %1032 = vmatpush1.bf16.msra.mxu0 %v1374_v47 }
  0x2a   :  { %1034 = vmatprep.subr.bf16.mxu0 %v1379_v48  ;;  %1056 = vmatpush3.bf16.msra.mxu1 %v1395_v61 }
  0x2b   :  { %1057 = vmatprep.subr.bf16.mxu1 %v1258_v33 }
  0x2d   :  { %1036 = vmatpush1.bf16.msra.mxu0 %v1387_v56 }
  0x2e   :  { %1038 = vmatprep.subr.bf16.mxu0 %v1392_v57  ;;  %1059 = vmatpush3.bf16.msra.mxu1 %v1405_v6 }
  0x2f   :  { %1060 = vmatprep.subr.bf16.mxu1 %v1258_v33 }
  0x31   :  { %1040 = vmatpush1.bf16.msra.mxu0 %v1399_v2 }
  0x32   :  { %1042 = vmatprep.subr.bf16.mxu0 %v1402_v3  ;;  %1062 = vmatpush3.bf16.msra.mxu1 %v1413_v13 }
  0x33   :  { %1063 = vmatprep.subr.bf16.mxu1 %v1258_v33 }
  0x35   :  { %1044 = vmatpush1.bf16.msra.mxu0 %v1409_v10 }
  0x36   :  { %1070 = vmatprep.subr.bf16.mxu0 %v1321_v7  ;;  %1065 = vmatpush3.bf16.msra.mxu1 %v1423_v19 }
  0x37   :  { %1066 = vmatprep.subr.bf16.mxu1 %v1258_v33 }
  0x38   :  { %379 = vmatmul.mubr.f32.vlgmr.msra.gmra.mrb[0].mxu0 %v1420_v16 }
  0x39   :  { %1072 = vmatpush1.bf16.msra.mxu0 %v1324_v11  ;;  %547 = vmatprep.mubr.f32.mxu0 %v1256_v0 }
  0x3a   :  { %1074 = vmatprep.subr.bf16.mxu0 %v1326_v12  ;;  %1068 = vmatpush3.bf16.msra.mxu1 %v1431_v22 }
  0x3b   :  { %1101 = vmatprep.subr.bf16.mxu1 %v1258_v33 }
  0x3d   :  { %1076 = vmatpush1.bf16.msra.mxu0 %v1331_v17  ;;  %941 = vmatmul.mubr.f32.vlgmr.msra.gmra.mrb[6].mxu1 %v1420_v16 }
  0x3e   :  { %1078 = vmatprep.subr.bf16.mxu0 %v1334_v18  ;;  %1103 = vmatpush3.bf16.msra.mxu1 %v1353_v34 }
  0x3f   :  { %1104 = vmatprep.subr.bf16.mxu1 %v1258_v33  ;;  %975 = vmatprep.mubr.msk.f32.mxu1 %vm1257_vm0, %v1256_v0 }
  0x41   :  { %1080 = vmatpush1.bf16.msra.mxu0 %v1337_v23 }
  0x42   :  { %1082 = vmatprep.subr.bf16.mxu0 %v1346_v26  ;;  %1106 = vmatpush3.bf16.msra.mxu1 %v1367_v43 }
  0x43   :  { %1107 = vmatprep.subr.bf16.mxu1 %v1258_v33 }
  0x45   :  { %1084 = vmatpush1.bf16.msra.mxu0 %v1359_v36 }
  0x46   :  { %1086 = vmatprep.subr.bf16.mxu0 %v1364_v39  ;;  %1109 = vmatpush3.bf16.msra.mxu1 %v1382_v52 }
  0x47   :  { %1110 = vmatprep.subr.bf16.mxu1 %v1258_v33 }
  0x49   :  { %1088 = vmatpush1.bf16.msra.mxu0 %v1374_v47 }
  0x4a   :  { %1090 = vmatprep.subr.bf16.mxu0 %v1379_v48  ;;  %1112 = vmatpush3.bf16.msra.mxu1 %v1395_v61 }
  0x4b   :  { %1113 = vmatprep.subr.bf16.mxu1 %v1258_v33 }
  0x4d   :  { %1092 = vmatpush1.bf16.msra.mxu0 %v1387_v56 }
  0x4e   :  { %1094 = vmatprep.subr.bf16.mxu0 %v1392_v57  ;;  %1115 = vmatpush3.bf16.msra.mxu1 %v1405_v6 }
  0x4f   :  { %1116 = vmatprep.subr.bf16.mxu1 %v1258_v33 }
  0x51   :  { %1096 = vmatpush1.bf16.msra.mxu0 %v1399_v2 }
  0x52   :  { %1098 = vmatprep.subr.bf16.mxu0 %v1402_v3  ;;  %1118 = vmatpush3.bf16.msra.mxu1 %v1413_v13 }
  0x53   :  { %1119 = vmatprep.subr.bf16.mxu1 %v1258_v33 }
  0x55   :  { %1100 = vmatpush1.bf16.msra.mxu0 %v1409_v10 }
  0x56   :  { %1126 = vmatprep.subr.bf16.mxu0 %v1321_v7  ;;  %1121 = vmatpush3.bf16.msra.mxu1 %v1423_v19  ;;  %v56_v7 = vrot.slane %v43_v28, %v55_v27 }
  0x57   :  { %1122 = vmatprep.subr.bf16.mxu1 %v1258_v33 }
  0x5a   :  { %1124 = vmatpush3.bf16.msra.mxu1 %v1431_v22 }
  0x5b   :  { %1157 = vmatprep.subr.bf16.mxu1 %v1258_v33 }
  0xef   :  { %v229_v29 = vpop.f32.mrb[0].mxu1 }
  0xf0   :  { %v901_v30 = vpop.f32.mrb[1].mxu1  ;;  %v230_v5 = vadd.f32 %v229_v29, %v56_v7 }
  0xf3   :  { %v234_v31 = vpop.f32.mrb[2].mxu1 }
  0xf4   :  { %v1473_v32 = vadd.f32 %v234_v31, %v56_v7  ;;  %v904_v35 = vpop.f32.mrb[3].mxu1 }
  0xf7   :  { %v239_v37 = vpop.f32.mrb[4].mxu1 }
  0xf8   :  { %v1475_v38 = vadd.f32 %v239_v37, %v56_v7  ;;  %v907_v40 = vpop.f32.mrb[5].mxu1 }
 0x10b   :  { %v380_v44 = vpop.f32.mrb[0].mxu0 }
 0x10c   :  { %v1181_v45 = vadd.f32 %v380_v44, %v1477_v42  ;;  %v382_v49 = vpop.f32.mrb[1].mxu0 }
 0x10d   :  { %v1182_v53 = vadd.f32 %v382_v49, %v1480_v51 }
 0x10e   :  { %v834_v50 = vmul.f32 -1.442695, %v1181_v45 }
 0x10f   :  { %v835_v58 = vmul.f32 -1.442695, %v1182_v53 }
 0x110   :  { %1199 = vpow2.f32 %v834_v50  ;;  %v451_v54 = vpop.f32.mrb[6].mxu1 }
 0x111   :  { %v942_v55 = vpop.f32.mrb[7].mxu1  ;;  %1201 = vpow2.f32 %v835_v58  ;;  %v469_v63 = vadd.f32 %v1486_v62, %v451_v54 }
 0x11a   :  { %v1200_v59 = vpop.eup %1199 }
 0x11b   :  { %v463_v60 = vadd.f32 1.0, %v1200_v59  ;;  %v1202_v1 = vpop.eup %1201 }
 0x11c   :  { %v464_v9 = vadd.f32 1.0, %v1202_v1 }
 0x11d   :  { %1203 = vrcp.f32 %v463_v60 }
 0x127   :  { %v1204_v4 = vpop.eup %1203 }
 0x128   :  { %v470_v8 = vmul.f32 %v1204_v4, %v469_v63 }
 0x12a   :  { %v471_v14 = vadd.f32 %v470_v8, %v230_v5 }
 0x12c   :  { %1205 = vtanh.f32 %v471_v14 }
 0x12d   :  { %1207 = vrcp.f32 %v464_v9 }
 0x136   :  { %v1206_v15 = vpop.eup %1205 }
 0x137   :  { %v473_v20 = vsub.f32 %v1420_v16, %v1206_v15  ;;  %v1208_v21 = vpop.eup %1207 }
 0x139   :  { %v474_v24 = vmul.f32 %v1208_v21, %v473_v20 }
 0x13b   :  { %v475_v25 = vadd.f32 %v1206_v15, %v474_v24 }
 0x13d   :  { %476 = vst [vmem:[%s1546_s6] sm:$0xff] %v475_v25  ;;  %548 = vmatmul.mubr.f32.vlgmr.msra.gmra.mrb[2].mxu0 %v475_v25  ;;  %976 = vmatmul.mubr.f32.vlgmr.msra.gmra.mrb[8].mxu1 %v475_v25 }
 0x13e   :  { %1128 = vmatpush1.bf16.msra.mxu0 %v1324_v11  ;;  %1159 = vmatpush3.bf16.msra.mxu1 %v1353_v34 }
 0x13f   :  { %1130 = vmatprep.subr.bf16.mxu0 %v1326_v12  ;;  %1160 = vmatprep.subr.bf16.mxu1 %v1258_v33 }
 0x140   :  { %717 = vmatprep.mubr.f32.mxu0 %v1256_v0  ;;  %1010 = vmatprep.mubr.msk.f32.mxu1 %vm1257_vm0, %v1256_v0 }
 0x142   :  { %1132 = vmatpush1.bf16.msra.mxu0 %v1331_v17  ;;  %1162 = vmatpush3.bf16.msra.mxu1 %v1367_v43 }
 0x143   :  { %1134 = vmatprep.subr.bf16.mxu0 %v1334_v18  ;;  %1163 = vmatprep.subr.bf16.mxu1 %v1258_v33 }
 0x146   :  { %1136 = vmatpush1.bf16.msra.mxu0 %v1337_v23  ;;  %1165 = vmatpush3.bf16.msra.mxu1 %v1382_v52 }
 0x147   :  { %1138 = vmatprep.subr.bf16.mxu0 %v1346_v26  ;;  %1166 = vmatprep.subr.bf16.mxu1 %v1258_v33 }
 0x14a   :  { %1140 = vmatpush1.bf16.msra.mxu0 %v1359_v36  ;;  %1168 = vmatpush3.bf16.msra.mxu1 %v1395_v61 }
 0x14b   :  { %1142 = vmatprep.subr.bf16.mxu0 %v1364_v39  ;;  %1169 = vmatprep.subr.bf16.mxu1 %v1258_v33 }
 0x14e   :  { %1144 = vmatpush1.bf16.msra.mxu0 %v1374_v47  ;;  %1171 = vmatpush3.bf16.msra.mxu1 %v1405_v6 }
 0x14f   :  { %1146 = vmatprep.subr.bf16.mxu0 %v1379_v48  ;;  %1172 = vmatprep.subr.bf16.mxu1 %v1258_v33 }
 0x152   :  { %1148 = vmatpush1.bf16.msra.mxu0 %v1387_v56  ;;  %1174 = vmatpush3.bf16.msra.mxu1 %v1413_v13 }
 0x153   :  { %1150 = vmatprep.subr.bf16.mxu0 %v1392_v57  ;;  %1175 = vmatprep.subr.bf16.mxu1 %v1258_v33 }
 0x156   :  { %1152 = vmatpush1.bf16.msra.mxu0 %v1399_v2  ;;  %1177 = vmatpush3.bf16.msra.mxu1 %v1423_v19 }
 0x157   :  { %1154 = vmatprep.subr.bf16.mxu0 %v1402_v3  ;;  %1178 = vmatprep.subr.bf16.mxu1 %v1258_v33 }
 0x15a   :  { %1156 = vmatpush1.bf16.msra.mxu0 %v1409_v10  ;;  %1180 = vmatpush3.bf16.msra.mxu1 %v1431_v22 }
 0x210   :  { %v549_v0 = vpop.f32.mrb[2].mxu0  ;;  %v620_v11 = vpop.f32.mrb[8].mxu1 }
 0x211   :  { %v1183_v12 = vadd.f32 %v549_v0, %v1477_v42  ;;  %v551_v17 = vpop.f32.mrb[3].mxu0  ;;  %v977_v18 = vpop.f32.mrb[9].mxu1  ;;  %v638_v43 = vadd.f32 %v1486_v62, %v620_v11 }
 0x212   :  { %v1184_v26 = vadd.f32 %v551_v17, %v1480_v51 }
 0x213   :  { %v836_v23 = vmul.f32 -1.442695, %v1183_v12 }
 0x214   :  { %v837_v34 = vmul.f32 -1.442695, %v1184_v26 }
 0x215   :  { %1209 = vpow2.f32 %v836_v23 }
 0x216   :  { %1211 = vpow2.f32 %v837_v34 }
 0x21f   :  { %v1210_v36 = vpop.eup %1209 }
 0x220   :  { %v632_v39 = vadd.f32 1.0, %v1210_v36  ;;  %v1212_v33 = vpop.eup %1211 }
 0x221   :  { %v633_v56 = vadd.f32 1.0, %v1212_v33 }
 0x222   :  { %1213 = vrcp.f32 %v632_v39 }
 0x22c   :  { %v1214_v47 = vpop.eup %1213 }
 0x22d   :  { %v639_v48 = vmul.f32 %v1214_v47, %v638_v43 }
 0x22f   :  { %v640_v52 = vadd.f32 %v639_v48, %v1473_v32 }
 0x231   :  { %1215 = vtanh.f32 %v640_v52 }
 0x232   :  { %1217 = vrcp.f32 %v633_v56 }
 0x23b   :  { %v1216_v57 = vpop.eup %1215 }
 0x23c   :  { %v642_v61 = vsub.f32 %v475_v25, %v1216_v57  ;;  %v1218_v2 = vpop.eup %1217 }
 0x23e   :  { %v643_v3 = vmul.f32 %v1218_v2, %v642_v61 }
 0x240   :  { %v644_v6 = vadd.f32 %v1216_v57, %v643_v3 }
 0x242   :  { %838 = vst [vmem:[%s1546_s6 + $0x8] sm:$0xff] %v644_v6  ;;  %718 = vmatmul.mubr.f32.vlgmr.msra.gmra.mrb[4].mxu0 %v644_v6  ;;  %1011 = vmatmul.mubr.f32.vlgmr.msra.gmra.mrb[10].mxu1 %v644_v6 }
 0x315   :  { %v719_v10 = vpop.f32.mrb[4].mxu0  ;;  %v790_v13 = vpop.f32.mrb[10].mxu1 }
 0x316   :  { %v1185_v16 = vadd.f32 %v719_v10, %v1477_v42  ;;  %v721_v19 = vpop.f32.mrb[5].mxu0  ;;  %v1012_v22 = vpop.f32.mrb[11].mxu1  ;;  %v808_v32 = vadd.f32 %v1486_v62, %v790_v13 }
 0x317   :  { %v1186_v28 = vadd.f32 %v721_v19, %v1480_v51 }
 0x318   :  { %v839_v27 = vmul.f32 -1.442695, %v1185_v16 }
 0x319   :  { %v840_v29 = vmul.f32 -1.442695, %v1186_v28 }
 0x31a   :  { %1219 = vpow2.f32 %v839_v27 }
 0x31b   :  { %1221 = vpow2.f32 %v840_v29 }
 0x324   :  { %v1220_v30 = vpop.eup %1219 }
 0x325   :  { %v802_v7 = vadd.f32 1.0, %v1220_v30  ;;  %v1222_v31 = vpop.eup %1221 }
 0x326   :  { %v803_v41 = vadd.f32 1.0, %v1222_v31 }
 0x327   :  { %1223 = vrcp.f32 %v802_v7 }
 0x331   :  { %v1224_v35 = vpop.eup %1223 }
 0x332   :  { %v809_v37 = vmul.f32 %v1224_v35, %v808_v32 }
 0x334   :  { %v810_v40 = vadd.f32 %v809_v37, %v1475_v38 }
 0x336   :  { %1225 = vtanh.f32 %v810_v40 }
 0x337   :  { %1227 = vrcp.f32 %v803_v41 }
 0x340   :  { %v1226_v42 = vpop.eup %1225 }
 0x341   :  { %v812_v44 = vsub.f32 %v644_v6, %v1226_v42  ;;  %v1228_v45 = vpop.eup %1227 }
 0x343   :  { %v813_v46 = vmul.f32 %v1228_v45, %v812_v44 }
 0x345   :  { %v814_v49 = vadd.f32 %v1226_v42, %v813_v46 }
 0x347   :  { %841 = vst [vmem:[%s1546_s6 + $0x10] sm:$0xff] %v814_v49 }
 0x348   :  { %821 = vsyncpa [#allocation4], 1 }

</bundles_post_ra>
